<compile_context>
chip_gen: v5e
topology: v5e:2x2
jax: 0.10.0
libtpu: 0.0.40
codegen_flags: <defaults>
</compile_context>

<pallas_src>
import jax
import jax.numpy as jnp
from jax import lax
from jax.experimental import pallas as pl
from jax.experimental.pallas import tpu as pltpu


def _round_up(x, m):
    return (x + m - 1) // m * m


# --------------------------------------------------------------------------
# Kernel
# --------------------------------------------------------------------------
def make_kernel(num_hidden, tile_b):
    """Fused kernel: SMEM-indexed embedding gather + BN-folded MLP."""
    n_wb = 2 * (num_hidden + 1)   # (W, b) pairs: hidden layers + final layer

    def kernel(idx_ref, table_ref, *rest):
        wb_refs = rest[:n_wb]
        out_ref = rest[n_wb]
        emb_ref = rest[n_wb + 1]

        b_total = idx_ref.shape[0]          # full batch (Python int)
        n_rows = table_ref.shape[0]         # vocabulary size
        base = pl.program_id(0) * tile_b

        # ---- Embedding gather: table rows -> VMEM scratch ----------------
        # Indices live in SMEM (scalar prefetch); each row is a dynamic slice
        # of the VMEM-resident table.  Clamp both the batch position (partial
        # last tile) and the row id (defensive OOB guard).
        def gather_row(r, carry):
            g = jnp.minimum(base + r, b_total - 1)
            row = jnp.clip(idx_ref[g], 0, n_rows - 1)
            emb_ref[pl.ds(r, 1), :] = table_ref[pl.ds(row, 1), :]
            return carry

        lax.fori_loop(0, tile_b, gather_row, 0)

        # embedding_dropout: identity in inference mode.

        # ---- MLP: (Linear + ReLU) x num_hidden, then final Linear ---------
        # BatchNorm (eval) has been folded into the following Linear on host.
        h = emb_ref[...]                                  # (tile_b, E) f32
        for l in range(num_hidden):
            w_ref, b_ref = wb_refs[2 * l], wb_refs[2 * l + 1]
            h = jnp.dot(h.astype(w_ref.dtype), w_ref[...],
                        preferred_element_type=jnp.float32) + b_ref[...]
            h = jnp.maximum(h, 0.0)                       # ReLU (Dropout = id)

        wf_ref, bf_ref = wb_refs[-2], wb_refs[-1]
        out_ref[...] = (jnp.dot(h.astype(wf_ref.dtype), wf_ref[...],
                                preferred_element_type=jnp.float32)
                        + bf_ref[...]).astype(out_ref.dtype)

    return kernel


# --------------------------------------------------------------------------
# Host-side parameter folding (BN -> next Linear) and packing
# --------------------------------------------------------------------------
def fold_params(params, out_pad, weight_dtype=jnp.bfloat16):
    """Fold eval-mode BatchNorm into the *following* Linear; pad the final
    output dim to `out_pad` lanes for a lane-dense store."""
    packed = []
    prev_scale = prev_shift = None
    for layer in params["hidden"]:
        w0, b0 = layer["w"], layer["b"]
        if prev_scale is None:
            w, b = w0, b0
        else:
            w = prev_scale.reshape(-1, 1) * w0            # row-scale
            b = b0 + prev_shift @ w0
        packed.append((w.astype(weight_dtype), b.astype(jnp.float32)))
        prev_scale, prev_shift = layer["scale"], layer["shift"]

    fw0, fb0 = params["final"]
    if prev_scale is None:
        fw, fb = fw0, fb0
    else:
        fw = prev_scale.reshape(-1, 1) * fw0
        fb = fb0 + prev_shift @ fw0
    in_f, n_out = fw.shape
    fw_p = jnp.zeros((in_f, out_pad), weight_dtype).at[:, :n_out].set(
        fw.astype(weight_dtype))
    fb_p = jnp.zeros((1, out_pad), jnp.float32).at[:, :n_out].set(
        fb.astype(jnp.float32))
    packed.append((fw_p, fb_p))
    return packed


# --------------------------------------------------------------------------
# Wrapper
# --------------------------------------------------------------------------
def model_forward(x_categorical, params, *, tile_b=None):
    table = params["embedding"].astype(jnp.float32)       # (C, E)
    num_hidden = len(params["hidden"])
    out_size = params["final"][0].shape[1]

    B = x_categorical.shape[0]
    # Only the first categorical column is used (reference forward() returns
    # inside the embedding loop).
    idx = x_categorical[:, 0].astype(jnp.int32)           # (B,) -> SMEM prefetch

    out_pad = _round_up(max(out_size, 128), 128)          # lane-dense output
    packed = fold_params(params, out_pad)

    if tile_b is None:
        # Prefer MXU-sized batch tiles (128 on v5e, 256 on v6e/v7x) for large
        # batches; shrink (8-aligned) for tiny demo batches.
        tile_b = min(256, _round_up(B, 8))
    num_tiles = pl.cdiv(B, tile_b)

    inputs = [table]
    for w, b in packed:
        inputs += [w, b]

    # Constant index_map: params/table stay VMEM-resident across grid steps.
    const_map = lambda i, idx_ref: (0, 0)
    in_specs = [pl.BlockSpec(a.shape, const_map) for a in inputs]
    out_spec = pl.BlockSpec((tile_b, out_pad), lambda i, idx_ref: (i, 0))

    # Advisory cost estimate for the XLA scheduler.
    dims = [table.shape[1]] + [int(w.shape[1]) for w, _ in packed]
    flops = 2 * B * sum(a * b for a, b in zip(dims[:-1], dims[1:]))
    bytes_accessed = (idx.size * 4
                      + sum(int(a.size) * a.dtype.itemsize for a in inputs)
                      + B * out_pad * 4)

    out = pl.pallas_call(
        make_kernel(num_hidden, tile_b),
        out_shape=jax.ShapeDtypeStruct((B, out_pad), jnp.float32),
        grid_spec=pltpu.PrefetchScalarGridSpec(
            num_scalar_prefetch=1,
            grid=(num_tiles,),
            in_specs=in_specs,
            out_specs=out_spec,
            # TODO(synk): for very large vocabularies keep the table in HBM
            # (memory_space=pl.ANY) and DMA only the gathered rows.
            scratch_shapes=[pltpu.VMEM((tile_b, table.shape[1]), jnp.float32)],
        ),
        compiler_params=pltpu.CompilerParams(
            dimension_semantics=("parallel",)),
        cost_estimate=pl.CostEstimate(flops=flops, transcendentals=0,
                                      bytes_accessed=bytes_accessed),
    )(idx, *inputs)

    return out[:, :out_size]


# --------------------------------------------------------------------------
# Synthetic parameters + pure-JAX reference (eval-mode semantics)
# --------------------------------------------------------------------------
def init_params(key, embedding_size, layers, output_size, eps=1e-5):
    keys = iter(jax.random.split(key, 4 + 6 * len(layers)))

    num_cat, emb_dim = embedding_size[0]
    table = jax.random.normal(next(keys), (num_cat, emb_dim), jnp.float32)

    hidden = []
    in_f = emb_dim
    for out_f in layers:
        w = jax.random.normal(next(keys), (in_f, out_f), jnp.float32) / jnp.sqrt(in_f)
        b = 0.1 * jax.random.normal(next(keys), (1, out_f), jnp.float32)
        gamma = 1.0 + 0.1 * jax.random.normal(next(keys), (1, out_f), jnp.float32)
        beta = 0.1 * jax.random.normal(next(keys), (1, out_f), jnp.float32)
        rmean = 0.1 * jax.random.normal(next(keys), (1, out_f), jnp.float32)
        rvar = jnp.abs(jax.random.normal(next(keys), (1, out_f), jnp.float32)) + 0.5
        scale = gamma / jnp.sqrt(rvar + eps)              # folded BN (eval)
        shift = beta - rmean * scale
        hidden.append(dict(w=w, b=b, scale=scale, shift=shift))
        in_f = out_f

    fw = jax.random.normal(next(keys), (in_f, output_size), jnp.float32) / jnp.sqrt(in_f)
    fb = 0.1 * jax.random.normal(next(keys), (1, output_size), jnp.float32)
    return dict(embedding=table, hidden=hidden, final=(fw, fb))


def reference_forward(x_categorical, params):
    """Pure-JAX eval-mode reference (f32, unfolded BN) for validation."""
    idx = x_categorical[:, 0]
    h = params["embedding"][idx]
    for layer in params["hidden"]:
        h = jnp.maximum(h @ layer["w"] + layer["b"], 0.0)
        h = h * layer["scale"] + layer["shift"]
    fw, fb = params["final"]
    return h @ fw + fb


if __name__ == "__main__":
    embedding_size = [(10, 32)]   # single categorical column -> 32-d embedding
    layers = [64, 32]
    output_size = 4
    batch = 8

    key = jax.random.PRNGKey(0)
    k_idx, k_params = jax.random.split(key)

    x_categorical = jax.random.randint(
        k_idx, (batch, len(embedding_size)), 0, embedding_size[0][0],
        dtype=jnp.int32)
    params = init_params(k_params, embedding_size, layers, output_size)

    out = jax.block_until_ready(model_forward(x_categorical, params))
    ref = jax.block_until_ready(reference_forward(x_categorical, params))

    assert out.shape == (batch, output_size), out.shape
    assert bool(jnp.all(jnp.isfinite(out)))
    rel_err = float(jnp.max(jnp.abs(out - ref))) / (1.0 + float(jnp.max(jnp.abs(ref))))
    assert rel_err < 0.1, f"mismatch vs reference: rel-max err {rel_err}"
    print("KERNEL_OK")
</pallas_src>

<mosaic_0001>
module attributes {stable_mosaic.version = 11 : i64} {
  func.func @kernel(%arg0: i32, %arg1: memref<8xi32, #tpu.memory_space<smem>>, %arg2: memref<10x32xf32, #tpu.memory_space<vmem>>, %arg3: memref<32x64xbf16, #tpu.memory_space<vmem>>, %arg4: memref<1x64xf32, #tpu.memory_space<vmem>>, %arg5: memref<64x32xbf16, #tpu.memory_space<vmem>>, %arg6: memref<1x32xf32, #tpu.memory_space<vmem>>, %arg7: memref<32x128xbf16, #tpu.memory_space<vmem>>, %arg8: memref<1x128xf32, #tpu.memory_space<vmem>>, %arg9: memref<8x128xf32, #tpu.memory_space<vmem>>, %arg10: memref<8x32xf32, #tpu.memory_space<vmem>>) attributes {dimension_semantics = [#tpu.dimension_semantics<parallel>], iteration_bounds = array<i64: 1>, scalar_prefetch = 1 : i64, scratch_operands = 1 : i64, tpu.core_type = #tpu.core_type<tc>, window_params = [{pipeline_mode = #tpu.pipeline_mode<synchronous>, transform_indices = @transform_0, window_bounds = array<i64: 10, 32>}, {pipeline_mode = #tpu.pipeline_mode<synchronous>, transform_indices = @transform_1, window_bounds = array<i64: 32, 64>}, {pipeline_mode = #tpu.pipeline_mode<synchronous>, transform_indices = @transform_2, window_bounds = array<i64: 1, 64>}, {pipeline_mode = #tpu.pipeline_mode<synchronous>, transform_indices = @transform_3, window_bounds = array<i64: 64, 32>}, {pipeline_mode = #tpu.pipeline_mode<synchronous>, transform_indices = @transform_4, window_bounds = array<i64: 1, 32>}, {pipeline_mode = #tpu.pipeline_mode<synchronous>, transform_indices = @transform_5, window_bounds = array<i64: 32, 128>}, {pipeline_mode = #tpu.pipeline_mode<synchronous>, transform_indices = @transform_6, window_bounds = array<i64: 1, 128>}, {transform_indices = @transform_7, window_bounds = array<i64: 8, 128>}]} {
    %c8_i32 = arith.constant 8 : i32
    %0 = arith.muli %arg0, %c8_i32 : i32
    %c0_i32 = arith.constant 0 : i32
    %c8_i32_0 = arith.constant 8 : i32
    %1 = arith.addi %c0_i32, %c8_i32_0 : i32
    %c1_i32 = arith.constant 1 : i32
    scf.for %arg11 = %c0_i32 to %1 step %c1_i32  : i32 {
      %26 = arith.addi %0, %arg11 : i32
      %c7_i32 = arith.constant 7 : i32
      %27 = arith.minsi %26, %c7_i32 : i32
      %28 = arith.index_cast %27 : i32 to index
      %29 = memref.load %arg1[%28] : memref<8xi32, #tpu.memory_space<smem>>
      %c0_i32_21 = arith.constant 0 : i32
      %c9_i32 = arith.constant 9 : i32
      %30 = arith.maxsi %c0_i32_21, %29 : i32
      %31 = arith.minsi %c9_i32, %30 : i32
      %32 = arith.index_cast %31 : i32 to index
      %c0_22 = arith.constant 0 : index
      %33 = vector.load %arg2[%32, %c0_22] : memref<10x32xf32, #tpu.memory_space<vmem>>, vector<1x32xf32>
      %34 = arith.index_cast %arg11 : i32 to index
      %c0_23 = arith.constant 0 : index
      %35 = vector.load %arg10[%34, %c0_23] : memref<8x32xf32, #tpu.memory_space<vmem>>, vector<1x32xf32>
      tpu.vector_store %arg10[%34, %c0_23], %33 {strides = array<i32>} : memref<8x32xf32, #tpu.memory_space<vmem>>, vector<1x32xf32>,
    }
    %c8_i32_1 = arith.constant 8 : i32
    %c0 = arith.constant 0 : index
    %c0_2 = arith.constant 0 : index
    %2 = vector.load %arg10[%c0, %c0_2] : memref<8x32xf32, #tpu.memory_space<vmem>>, vector<8x32xf32>
    %3 = arith.truncf %2 : vector<8x32xf32> to vector<8x32xbf16>
    %c0_3 = arith.constant 0 : index
    %c0_4 = arith.constant 0 : index
    %4 = vector.load %arg3[%c0_3, %c0_4] : memref<32x64xbf16, #tpu.memory_space<vmem>>, vector<32x64xbf16>
    %cst = arith.constant dense<0.000000e+00> : vector<8x64xf32>
    %5 = tpu.matmul %3, %4, %cst {dimension_numbers = #tpu.dot_dimension_numbers<[1], [0], [0], [1], [0, 0, 1, 1], [], []>} : vector<8x32xbf16>, vector<32x64xbf16>, vector<8x64xf32> -> vector<8x64xf32>
    %c0_5 = arith.constant 0 : index
    %c0_6 = arith.constant 0 : index
    %6 = vector.load %arg4[%c0_5, %c0_6] : memref<1x64xf32, #tpu.memory_space<vmem>>, vector<1x64xf32>
    %7 = vector.broadcast %6 : vector<1x64xf32> to vector<8x64xf32>
    %8 = arith.addf %5, %7 : vector<8x64xf32>
    %cst_7 = arith.constant 0.000000e+00 : f32
    %9 = vector.broadcast %cst_7 : f32 to vector<8x64xf32>
    %10 = arith.maximumf %8, %9 : vector<8x64xf32>
    %11 = arith.truncf %10 : vector<8x64xf32> to vector<8x64xbf16>
    %c0_8 = arith.constant 0 : index
    %c0_9 = arith.constant 0 : index
    %12 = vector.load %arg5[%c0_8, %c0_9] : memref<64x32xbf16, #tpu.memory_space<vmem>>, vector<64x32xbf16>
    %cst_10 = arith.constant dense<0.000000e+00> : vector<8x32xf32>
    %13 = tpu.matmul %11, %12, %cst_10 {dimension_numbers = #tpu.dot_dimension_numbers<[1], [0], [0], [1], [0, 0, 1, 1], [], []>} : vector<8x64xbf16>, vector<64x32xbf16>, vector<8x32xf32> -> vector<8x32xf32>
    %c0_11 = arith.constant 0 : index
    %c0_12 = arith.constant 0 : index
    %14 = vector.load %arg6[%c0_11, %c0_12] : memref<1x32xf32, #tpu.memory_space<vmem>>, vector<1x32xf32>
    %15 = vector.broadcast %14 : vector<1x32xf32> to vector<8x32xf32>
    %16 = arith.addf %13, %15 : vector<8x32xf32>
    %cst_13 = arith.constant 0.000000e+00 : f32
    %17 = vector.broadcast %cst_13 : f32 to vector<8x32xf32>
    %18 = arith.maximumf %16, %17 : vector<8x32xf32>
    %19 = arith.truncf %18 : vector<8x32xf32> to vector<8x32xbf16>
    %c0_14 = arith.constant 0 : index
    %c0_15 = arith.constant 0 : index
    %20 = vector.load %arg7[%c0_14, %c0_15] : memref<32x128xbf16, #tpu.memory_space<vmem>>, vector<32x128xbf16>
    %cst_16 = arith.constant dense<0.000000e+00> : vector<8x128xf32>
    %21 = tpu.matmul %19, %20, %cst_16 {dimension_numbers = #tpu.dot_dimension_numbers<[1], [0], [0], [1], [0, 0, 1, 1], [], []>} : vector<8x32xbf16>, vector<32x128xbf16>, vector<8x128xf32> -> vector<8x128xf32>
    %c0_17 = arith.constant 0 : index
    %c0_18 = arith.constant 0 : index
    %22 = vector.load %arg8[%c0_17, %c0_18] : memref<1x128xf32, #tpu.memory_space<vmem>>, vector<1x128xf32>
    %23 = vector.broadcast %22 : vector<1x128xf32> to vector<8x128xf32>
    %24 = arith.addf %21, %23 : vector<8x128xf32>
    %c0_19 = arith.constant 0 : index
    %c0_20 = arith.constant 0 : index
    %25 = vector.load %arg9[%c0_19, %c0_20] : memref<8x128xf32, #tpu.memory_space<vmem>>, vector<8x128xf32>
    tpu.vector_store %arg9[%c0_19, %c0_20], %24 {strides = array<i32>} : memref<8x128xf32, #tpu.memory_space<vmem>>, vector<8x128xf32>,
    return
  }
  func.func @transform_0(%arg0: i32, %arg1: memref<8xi32, #tpu.memory_space<smem>>) -> (i32, i32) {
    %c0_i32 = arith.constant 0 : i32
    %c0_i32_0 = arith.constant 0 : i32
    %c0_i32_1 = arith.constant 0 : i32
    return %c0_i32, %c0_i32_0 : i32, i32
  }
  func.func @transform_1(%arg0: i32, %arg1: memref<8xi32, #tpu.memory_space<smem>>) -> (i32, i32) {
    %c0_i32 = arith.constant 0 : i32
    %c0_i32_0 = arith.constant 0 : i32
    %c0_i32_1 = arith.constant 0 : i32
    return %c0_i32, %c0_i32_0 : i32, i32
  }
  func.func @transform_2(%arg0: i32, %arg1: memref<8xi32, #tpu.memory_space<smem>>) -> (i32, i32) {
    %c0_i32 = arith.constant 0 : i32
    %c0_i32_0 = arith.constant 0 : i32
    %c0_i32_1 = arith.constant 0 : i32
    return %c0_i32, %c0_i32_0 : i32, i32
  }
  func.func @transform_3(%arg0: i32, %arg1: memref<8xi32, #tpu.memory_space<smem>>) -> (i32, i32) {
    %c0_i32 = arith.constant 0 : i32
    %c0_i32_0 = arith.constant 0 : i32
    %c0_i32_1 = arith.constant 0 : i32
    return %c0_i32, %c0_i32_0 : i32, i32
  }
  func.func @transform_4(%arg0: i32, %arg1: memref<8xi32, #tpu.memory_space<smem>>) -> (i32, i32) {
    %c0_i32 = arith.constant 0 : i32
    %c0_i32_0 = arith.constant 0 : i32
    %c0_i32_1 = arith.constant 0 : i32
    return %c0_i32, %c0_i32_0 : i32, i32
  }
  func.func @transform_5(%arg0: i32, %arg1: memref<8xi32, #tpu.memory_space<smem>>) -> (i32, i32) {
    %c0_i32 = arith.constant 0 : i32
    %c0_i32_0 = arith.constant 0 : i32
    %c0_i32_1 = arith.constant 0 : i32
    return %c0_i32, %c0_i32_0 : i32, i32
  }
  func.func @transform_6(%arg0: i32, %arg1: memref<8xi32, #tpu.memory_space<smem>>) -> (i32, i32) {
    %c0_i32 = arith.constant 0 : i32
    %c0_i32_0 = arith.constant 0 : i32
    %c0_i32_1 = arith.constant 0 : i32
    return %c0_i32, %c0_i32_0 : i32, i32
  }
  func.func @transform_7(%arg0: i32, %arg1: memref<8xi32, #tpu.memory_space<smem>>) -> (i32, i32) {
    %c0_i32 = arith.constant 0 : i32
    %c0_i32_0 = arith.constant 0 : i32
    return %arg0, %c0_i32 : i32, i32
  }
}

</mosaic_0001>

<bundles_post_ra>
// kernel: tpu_custom_call.1
= control target key start
LH: loop header
LB: loop body
LE: loop exit
PB: predicated region body
PF: predicated region fallthrough
CT: control target
= control target key end

     0   :  { %s324_s30 = smov [#allocation4]   ;;  %s415_s0 = inlined_call_operand.hbm [shape: s32[8], index: 0, kind: input, shape index: {}]   ;;  %s416_s1 = inlined_call_operand.vmem [shape: f32[10,32], index: 1, kind: input, shape index: {}]   ;;  %s417_s2 = inlined_call_operand.vmem [shape: bf16[32,64], index: 2, kind: input, shape index: {}]   ;;  %s418_s3 = inlined_call_operand.vmem [shape: f32[1,64], index: 3, kind: input, shape index: {}]   ;;  %s419_s4 = inlined_call_operand.vmem [shape: bf16[64,32], index: 4, kind: input, shape index: {}]   ;;  %s420_s5 = inlined_call_operand.vmem [shape: f32[1,32], index: 5, kind: input, shape index: {}]   ;;  %s421_s6 = inlined_call_operand.vmem [shape: bf16[32,128], index: 6, kind: input, shape index: {}]   ;;  %s422_s7 = inlined_call_operand.vmem [shape: f32[1,128], index: 7, kind: input, shape index: {}]   ;;  %s423_s8 = inlined_call_operand.hbm [shape: f32[8,128], index: 8, kind: output, shape index: {}]  }
   0x1   :  { %s14_s29 = sshll.u32 %s415_s0, 4  ;;  %s15_s29 = int_to_ptr.hbm [resolvable:$true] %s14_s29 }
   0x2   :  { %17 = dma.hbm_to_smem %s15_s29, 16, %s324_s30, [#allocation3] }
   0x3   :  { %316 = dma.done.wait [#allocation3], 16 }
   0x4   :  { %317 = vsyncadd [#allocation3], 4294967280 }
   0x5   :  { %20 = sfence }
   0x6   :  { %21 = vsyncpa [#allocation6], 0  ;;  %s320_s9 = smov 0  }
   0x7 LB: > { %p45_p0 = scmp.lt.s32.totalorder %s322_s9, 7  ;;  %vm55_vm0 = vcmask 253952   ;;  %s54_s14 = scalar_lea.vmem [#allocation2], %s322_s9  ;;  %s322_s9 = sphi %s320_s9, %s43_s9  }
   0x9   : > { %s46_s10 = scalar_select %p45_p0, %s322_s9, 7 }
   0xa   : > { %s43_s9 = sadd.s32 1, %s322_s9  }
   0xb   : > { %s47_s11 = sld [smem:[#allocation4 + %s46_s10]]  ;;  %p40_p3 = scmp.ge.s32.totalorder %s43_s9, 8  }
   0xc   :  { %v256_v1 = vld [vmem:[%s417_s2 + $0x8] sm:$0xff] (%p40_p3)  ;;  %v255_v2 = vld [vmem:[%s417_s2] sm:$0xff] (%p40_p3)  ;;  %v260_v3 = vld [vmem:[%s419_s4 + $0x18] sm:$0xff] (%p40_p3)  ;;  %vm79_vm1 = vcmask (%p40_p3), 261120   ;;  %vm134_vm2 = vcmask (%p40_p3), 523264  }
   0xd   :  { %89 = vmatpush.bf16.msra.mxu0 (%p40_p3), %v256_v1  ;;  %142 = vmatpush.bf16.msra.mxu1 (%p40_p3), %v260_v3  ;;  %v259_v5 = vld [vmem:[%s419_s4 + $0x10] sm:$0xff] (%p40_p3)  ;;  %v258_v7 = vld [vmem:[%s419_s4 + $0x8] sm:$0xff] (%p40_p3)  ;;  %v257_v8 = vld [vmem:[%s419_s4] sm:$0xff] (%p40_p3) }
   0xe   :  { %v273_v9 = vld [vmem:[%s418_s3] ss:$0 sm:$0xff] (%p40_p3)  ;;  %v262_v15 = vld [vmem:[%s421_s6 + $0x8] sm:$0xff] (%p40_p3) }
   0xf   :  { %182 = vmatpush.bf16.msra.mxu2 (%p40_p3), %v262_v15  ;;  %v261_v16 = vld [vmem:[%s421_s6] sm:$0xff] (%p40_p3) }
  0x10   :  { %v274_v17 = vld [vmem:[%s420_s5] ss:$0 sm:$0xff] (%p40_p3) }
  0x11   : > { %p48_p1 = scmp.gt.s32.totalorder %s47_s11, 0  ;;  %p213_p2 = scmp.lt.s32.totalorder %s47_s11, 9  ;;  %90 = vmatpush.bf16.msra.mxu0 (%p40_p3), %v255_v2  ;;  %143 = vmatpush.bf16.msra.mxu1 (%p40_p3), %v259_v5  ;;  %v275_v23 = vld [vmem:[%s422_s7] ss:$0 sm:$0xff] (%p40_p3) }
  0x13   : > { %s425_s11 = smov (!%p48_p1, %s47_s11), 0  ;;  %42 = sbr.rel (!%p40_p3) target bundleno = 7 (0x7), region = 57  ;;  %183 = vmatpush.bf16.msra.mxu2 (%p40_p3), %v261_v16 }
  0x14   : > { %s427_s11 = smov (!%p213_p2, %s425_s11), 9 }
  0x15   : > { %s52_s13 = scalar_lea.vmem %s416_s1, %s427_s11  ;;  %144 = vmatpush.bf16.msra.mxu1 (%p40_p3), %v258_v7  ;;  %s325_s11 = smov (%p40_p3), [#allocation5]  }
  0x16   : > { %v53_v0 = vld [vmem:[%s52_s13] sm:$0x1]  ;;  %s195_s0 = sshll.u32 (%p40_p3), %s325_s11, 4  ;;  %s197_s13 = sshll.u32 (%p40_p3), %s423_s8, 4  ;;  %s196_s0 = int_to_ptr.vmem [resolvable:$true] %s195_s0  ;;  %s198_s13 = int_to_ptr.hbm [resolvable:$true] %s197_s13 }
  0x17   : > { %56 = vst.msk [vmem:[%s54_s14] sm:$0x1] %vm55_vm0, %v53_v0 }
  0x19   :  { %145 = vmatpush.bf16.msra.mxu1 %v257_v8 }
  0x1e   :  { %v57_v4 = vld [vmem:[#allocation2] sm:$0xff] }
  0x1f   :  { %v58_v6 = vpack.c.bf16 %v57_v4, %v57_v4 }
  0x21   :  { %226 = vmatmul.msk.bf16.vlgmr.msra.gmra.mxu0 %vm79_vm1, %v58_v6 }
  0x9e   :  { %v92_v10 = vpop.f32.mrf.mxu0 }
  0x9f   :  { %v93_v11 = vadd.f32 %v273_v9, %v92_v10 }
  0xa1   :  { %v96_v12 = vmax.f32 %v93_v11, 0.0 }
  0xa3   :  { %v97_v13 = vpack.c.bf16 %v96_v12, %v96_v12 }
  0xa5   :  { %243 = vmatmul.msk.bf16.vlgmr.msra.gmra.mxu1 %vm134_vm2, %v97_v13 }
  0xa6   :  { %v94_v14 = vpop.f32.mrf.mxu0 }
 0x122   :  { %v147_v18 = vpop.f32.mrf.mxu1 }
 0x123   :  { %v148_v19 = vadd.f32 %v274_v17, %v147_v18 }
 0x125   :  { %v151_v20 = vmax.f32 %v148_v19, 0.0 }
 0x127   :  { %v152_v21 = vpack.c.bf16 %v151_v20, %v151_v20 }
 0x129   :  { %252 = vmatmul.msk.bf16.vlgmr.msra.gmra.mxu2 %vm79_vm1, %v152_v21 }
 0x12a   :  { %v149_v22 = vpop.f32.mrf.mxu1 }
 0x1ac   :  { %v185_v24 = vpop.f32.mrf.mxu2 }
 0x1ad   :  { %v186_v25 = vadd.f32 %v275_v23, %v185_v24 }
 0x1af   :  { %189 = vst [vmem:[#allocation5] sm:$0xff] %v186_v25 }
 0x1b0   :  { %200 = dma.vmem_to_hbm [thread:$0]  %s196_s0, 128, %s198_s13, [#allocation6]  }
 0x1b4   :  { %v187_v26 = vpop.f32.mrf.mxu2 }
 0x1b5   :  { %318 = dma.done.wait [#allocation6], 128  }
 0x1b6   :  { %319 = vsyncadd [#allocation6], 4294967168 }
 0x1b7   :  { %205 = vsyncpa [#allocation6], 1 }

</bundles_post_ra>
